<compile_context>
chip_gen: v7x
topology: tpu7x:2x2x1
jax: 0.10.0
libtpu: 0.0.40
codegen_flags: <defaults>
</compile_context>

<pallas_src>
import math

import jax
import jax.numpy as jnp
import numpy as np
from jax.experimental import pallas as pl
from jax.experimental.pallas import tpu as pltpu


# -------------------- frequency / DCT constants (host-side, matches PyTorch) --------------------

def get_freq_indices(method):
    assert method in ['top1', 'top2', 'top4', 'top8', 'top16', 'top32',
                      'bot1', 'bot2', 'bot4', 'bot8', 'bot16', 'bot32',
                      'low1', 'low2', 'low4', 'low8', 'low16', 'low32']
    num_freq = int(method[3:])
    if 'top' in method:
        ax = [0, 0, 6, 0, 0, 1, 1, 4, 5, 1, 3, 0, 0, 0, 3, 2, 4, 6, 3, 5, 5, 2, 6, 5, 5, 3, 3, 4, 2, 2, 6, 1]
        ay = [0, 1, 0, 5, 2, 0, 2, 0, 0, 6, 0, 4, 6, 3, 5, 2, 6, 3, 3, 3, 5, 1, 1, 2, 4, 2, 1, 1, 3, 0, 5, 3]
    elif 'low' in method:
        ax = [0, 0, 1, 1, 0, 2, 2, 1, 2, 0, 3, 4, 0, 1, 3, 0, 1, 2, 3, 4, 5, 0, 1, 2, 3, 4, 5, 6, 1, 2, 3, 4]
        ay = [0, 1, 0, 1, 2, 0, 1, 2, 2, 3, 0, 0, 4, 3, 1, 5, 4, 3, 2, 1, 0, 6, 5, 4, 3, 2, 1, 0, 6, 5, 4, 3]
    else:  # 'bot'
        ax = [6, 1, 3, 3, 2, 4, 1, 2, 4, 4, 5, 1, 4, 6, 2, 5, 6, 1, 6, 2, 2, 4, 3, 3, 5, 5, 6, 2, 5, 5, 3, 6]
        ay = [6, 4, 4, 6, 6, 3, 1, 4, 4, 5, 6, 5, 2, 2, 5, 1, 4, 3, 5, 0, 3, 1, 1, 2, 4, 2, 1, 1, 5, 3, 3, 3]
    return ax[:num_freq], ay[:num_freq]


def _build_filter(pos, freq, POS):
    result = math.cos(math.pi * freq * (pos + 0.5) / POS) / math.sqrt(POS)
    return result if freq == 0 else result * math.sqrt(2)


def get_dct_filter(tile_h, tile_w, mapper_x, mapper_y, channel):
    f = np.zeros((channel, tile_h, tile_w), np.float32)
    c_part = channel // len(mapper_x)
    for i, (ux, vy) in enumerate(zip(mapper_x, mapper_y)):
        fx = np.array([_build_filter(tx, ux, tile_h) for tx in range(tile_h)], np.float32)
        fy = np.array([_build_filter(ty, vy, tile_w) for ty in range(tile_w)], np.float32)
        f[i * c_part:(i + 1) * c_part] = np.outer(fx, fy)[None]
    return jnp.asarray(f)


def _adaptive_pool_matrix(in_size, out_size):
    # Exact PyTorch adaptive_avg_pool1d bins as a (out, in) averaging matrix.
    m = np.zeros((out_size, in_size), np.float32)
    for i in range(out_size):
        a = (i * in_size) // out_size
        b = -((-(i + 1) * in_size) // out_size)  # ceil
        m[i, a:b] = 1.0 / (b - a)
    return jnp.asarray(m)


# -------------------- VMEM budgets --------------------

_FUSED_VMEM_BUDGET = 40 * 1024 * 1024   # max estimated footprint for the single-pass path
_FUSED_VMEM_LIMIT = 48 * 1024 * 1024    # scoped VMEM cap (< v7x 64 MiB physical)


# -------------------- Pallas kernels --------------------

def fused_kernel(x_ref, w_ref, w1_ref, w2_ref, o_ref):
    # x_ref:  (1, C, S)  one sample, spatial flattened on the lane axis (S = H*W)
    # w_ref:  (C, S)     effective (pool-folded) DCT filter, f32
    # w1_ref: (Cr, C)    fc[0].weight (PyTorch layout)
    # w2_ref: (C, Cr)    fc[2].weight (PyTorch layout)
    # o_ref:  (1, C, S)  scaled output (same slab, stored once)
    x = x_ref[0].astype(jnp.float32)                       # no-op when x is already f32
    y = jnp.sum(x * w_ref[...], axis=-1, keepdims=True)    # (C, 1)  XLU lane reduce
    h = jnp.maximum(jnp.dot(w1_ref[...], y,
                            preferred_element_type=jnp.float32), 0.0)   # (Cr, 1)
    z = jnp.dot(w2_ref[...], h, preferred_element_type=jnp.float32)     # (C, 1)
    s = 1.0 / (1.0 + jnp.exp(-z))                          # exact sigmoid; exp on the EUP slot
    o_ref[0] = (x * s).astype(o_ref.dtype)                 # scale resident slab, cast on store


def _make_reduce_mlp_kernel(total_s):
    # Fallback pass A: spatially tiled DCT reduce with VMEM accumulator; MLP+sigmoid fused into
    # the last spatial step.  grid = (N, n_spatial_tiles); reduction axis last ("arbitrary").
    def kernel(x_ref, w_ref, w1_ref, w2_ref, s_ref, acc_ref):
        si = pl.program_id(1)

        @pl.when(si == 0)
        def _init():
            acc_ref[...] = jnp.zeros_like(acc_ref)

        prod = x_ref[0].astype(jnp.float32) * w_ref[...]
        ts = prod.shape[-1]
        if total_s % ts != 0:
            # Mask the partial edge tile (OOB block reads are not guaranteed zero).
            col = si * ts + jax.lax.broadcasted_iota(jnp.int32, prod.shape, 1)
            prod = jnp.where(col < total_s, prod, 0.0)
        acc_ref[...] += jnp.sum(prod, axis=-1, keepdims=True)

        @pl.when(si == pl.num_programs(1) - 1)
        def _finish():
            y = acc_ref[...]                                             # (C, 1)
            h = jnp.maximum(jnp.dot(w1_ref[...], y,
                                    preferred_element_type=jnp.float32), 0.0)
            z = jnp.dot(w2_ref[...], h, preferred_element_type=jnp.float32)
            s_ref[0] = 1.0 / (1.0 + jnp.exp(-z))
    return kernel


def scale_kernel(x_ref, s_ref, o_ref):
    # Fallback pass B: x_ref (1, tc, ts) lane-dense block; s_ref (1, tc, 1) channel scale.
    o_ref[0] = (x_ref[0].astype(jnp.float32) * s_ref[0]).astype(o_ref.dtype)


# -------------------- wrapper --------------------

def multi_spectral_attention(x, params, *, force_two_pass=False):
    """x: (N, C, H, W) (NCHW, PyTorch layout). Returns x scaled by FcaNet channel attention."""
    N, C, H, W = x.shape
    dct_h, dct_w = params["dct_h"], params["dct_w"]
    w1, w2 = params["fc1_w"], params["fc2_w"]              # (Cr, C), (C, Cr)
    Cr = w1.shape[0]
    HW = H * W
    itemsize = x.dtype.itemsize

    # Fold adaptive-avg-pool + DCT projection into one full-resolution linear filter (exact:
    # both maps are linear).  Tiny einsum over weights only — x is never touched outside kernels.
    if (H, W) == (dct_h, dct_w):
        weff = params["dct_weight"].reshape(C, HW)
    else:
        Ph = _adaptive_pool_matrix(H, dct_h)                # (dct_h, H)
        Pw = _adaptive_pool_matrix(W, dct_w)                # (dct_w, W)
        weff = jnp.einsum('uh,cuv,vw->chw', Ph, params["dct_weight"], Pw).reshape(C, HW)
    weff = weff.astype(jnp.float32)

    xf = x.reshape(N, C, HW)                                # free reshape (contiguous dims)

    # VMEM budget of the fused path: x + out blocks (double-buffered) + weff + MLP weights.
    fused_need = 4 * C * HW * itemsize + 2 * C * HW * 4 + 4 * Cr * C * 4 + (1 << 20)
    use_fused = (not force_two_pass) and (fused_need <= _FUSED_VMEM_BUDGET)

    if use_fused:
        # Single pass over x: read once, write once.  grid=(N,) "parallel" -> both v7x TCs
        # busy for N >= 2; weff / w1 / w2 block indices are constant so they are DMA'd once.
        out = pl.pallas_call(
            fused_kernel,
            out_shape=jax.ShapeDtypeStruct((N, C, HW), x.dtype),
            grid=(N,),
            in_specs=[
                pl.BlockSpec((1, C, HW), lambda n: (n, 0, 0)),
                pl.BlockSpec((C, HW), lambda n: (0, 0)),
                pl.BlockSpec((Cr, C), lambda n: (0, 0)),
                pl.BlockSpec((C, Cr), lambda n: (0, 0)),
            ],
            out_specs=pl.BlockSpec((1, C, HW), lambda n: (n, 0, 0)),
            compiler_params=pltpu.CompilerParams(
                dimension_semantics=("parallel",),
                vmem_limit_bytes=_FUSED_VMEM_LIMIT),
        )(xf, weff, w1, w2)
        return out.reshape(N, C, H, W)

    # ---------------- fallback: two passes (per-sample slab does not fit VMEM) ----------------

    # Pass A: spatially tiled DCT reduce + SE MLP -> s (N, C, 1).
    if HW <= 2048:
        ts_a = HW                                           # single full-width spatial step
    else:
        ts_a = 2048                                         # multiple of 128 -> lane-dense
        while ts_a > 256 and 4 * C * ts_a * 4 > (24 << 20):
            ts_a //= 2
    n_sa = pl.cdiv(HW, ts_a)

    s = pl.pallas_call(
        _make_reduce_mlp_kernel(HW),
        out_shape=jax.ShapeDtypeStruct((N, C, 1), jnp.float32),
        grid=(N, n_sa),
        in_specs=[
            pl.BlockSpec((1, C, ts_a), lambda n, si: (n, 0, si)),
            pl.BlockSpec((C, ts_a), lambda n, si: (0, si)),
            pl.BlockSpec((Cr, C), lambda n, si: (0, 0)),
            pl.BlockSpec((C, Cr), lambda n, si: (0, 0)),
        ],
        out_specs=pl.BlockSpec((1, C, 1), lambda n, si: (n, 0, 0)),
        scratch_shapes=[pltpu.VMEM((C, 1), jnp.float32)],
        compiler_params=pltpu.CompilerParams(
            dimension_semantics=("parallel", "arbitrary"),
            vmem_limit_bytes=40 * 1024 * 1024),
    )(xf, weff, w1, w2)

    # Pass B: broadcast channel scale; fixed tiles + cdiv grid (edge blocks masked by Pallas).
    tc = C if (C <= 256 or C % 8 != 0) else 256
    ts_b = HW if HW <= 2048 else 2048
    out = pl.pallas_call(
        scale_kernel,
        out_shape=jax.ShapeDtypeStruct((N, C, HW), x.dtype),
        grid=(N, pl.cdiv(C, tc), pl.cdiv(HW, ts_b)),
        in_specs=[
            pl.BlockSpec((1, tc, ts_b), lambda n, ci, si: (n, ci, si)),
            pl.BlockSpec((1, tc, 1), lambda n, ci, si: (n, ci, 0)),
        ],
        out_specs=pl.BlockSpec((1, tc, ts_b), lambda n, ci, si: (n, ci, si)),
        compiler_params=pltpu.CompilerParams(
            dimension_semantics=("parallel", "parallel", "parallel"),
            vmem_limit_bytes=32 * 1024 * 1024),
    )(xf, s)
    return out.reshape(N, C, H, W)


# -------------------- param construction & reference --------------------

def make_params(key, channel, dct_h, dct_w, reduction=16, freq_sel_method='top16'):
    mapper_x, mapper_y = get_freq_indices(freq_sel_method)
    assert channel % len(mapper_x) == 0
    mapper_x = [t * (dct_h // 7) for t in mapper_x]
    mapper_y = [t * (dct_w // 7) for t in mapper_y]
    dct_weight = get_dct_filter(dct_h, dct_w, mapper_x, mapper_y, channel)

    cr = channel // reduction
    k1, k2 = jax.random.split(key)
    return {
        "dct_h": dct_h,
        "dct_w": dct_w,
        "dct_weight": dct_weight,                                            # (C, dct_h, dct_w)
        "fc1_w": 0.1 * jax.random.normal(k1, (cr, channel), jnp.float32),    # Linear(C, C//r)
        "fc2_w": 0.1 * jax.random.normal(k2, (channel, cr), jnp.float32),    # Linear(C//r, C)
    }


def reference(x, params):
    # Pure-JAX reference (same math as the PyTorch module, explicit pooling).
    N, C, H, W = x.shape
    dct_h, dct_w = params["dct_h"], params["dct_w"]
    if (H, W) != (dct_h, dct_w):
        Ph = _adaptive_pool_matrix(H, dct_h)
        Pw = _adaptive_pool_matrix(W, dct_w)
        xp = jnp.einsum('uh,nchw,vw->ncuv', Ph, x, Pw)
    else:
        xp = x
    y = jnp.sum(xp * params["dct_weight"][None], axis=(2, 3))
    h = jnp.maximum(y @ params["fc1_w"].T, 0.0)
    s = jax.nn.sigmoid(h @ params["fc2_w"].T)
    return x * s[:, :, None, None]


# -------------------- demo --------------------

if __name__ == "__main__":
    root = jax.random.PRNGKey(0)
    k1, k2, k3 = jax.random.split(root, 3)

    def run_case(name, key, N, C, H, W, dct_h, dct_w, reduction=16, force_two_pass=False):
        kx, kp = jax.random.split(key)
        x = jax.random.normal(kx, (N, C, H, W), jnp.float32)
        params = make_params(kp, C, dct_h, dct_w, reduction=reduction)
        out = jax.block_until_ready(
            multi_spectral_attention(x, params, force_two_pass=force_two_pass))
        assert out.shape == (N, C, H, W)
        err = float(jnp.max(jnp.abs(out - reference(x, params))))
        assert err < 1e-4, f"{name}: max abs err {err}"

    # Fused single-pass path, (H, W) == (dct_h, dct_w): read x once, write once.
    run_case("fused", k1, N=2, C=128, H=16, W=16, dct_h=16, dct_w=16)
    # Fused path with the adaptive average pool folded into the effective DCT filter.
    run_case("fused_pooled", k2, N=2, C=64, H=20, W=20, dct_h=14, dct_w=14)
    # Exercise the two-pass fallback (used when a per-sample slab exceeds the VMEM budget).
    run_case("two_pass", k3, N=2, C=128, H=16, W=16, dct_h=16, dct_w=16, force_two_pass=True)

    print("KERNEL_OK")
</pallas_src>

<mosaic_0001>
module attributes {stable_mosaic.version = 11 : i64} {
  func.func @fused_kernel(%arg0: i32, %arg1: memref<1x128x256xf32, #tpu.memory_space<vmem>>, %arg2: memref<128x256xf32, #tpu.memory_space<vmem>>, %arg3: memref<8x128xf32, #tpu.memory_space<vmem>>, %arg4: memref<128x8xf32, #tpu.memory_space<vmem>>, %arg5: memref<1x128x256xf32, #tpu.memory_space<vmem>>) attributes {dimension_semantics = [#tpu.dimension_semantics<parallel>], iteration_bounds = array<i64: 2>, scalar_prefetch = 0 : i64, scratch_operands = 0 : i64, tpu.core_type = #tpu.core_type<tc>, window_params = [{transform_indices = @transform_0, window_bounds = array<i64: 1, 128, 256>}, {pipeline_mode = #tpu.pipeline_mode<synchronous>, transform_indices = @transform_1, window_bounds = array<i64: 128, 256>}, {pipeline_mode = #tpu.pipeline_mode<synchronous>, transform_indices = @transform_2, window_bounds = array<i64: 8, 128>}, {pipeline_mode = #tpu.pipeline_mode<synchronous>, transform_indices = @transform_3, window_bounds = array<i64: 128, 8>}, {transform_indices = @transform_4, window_bounds = array<i64: 1, 128, 256>}]} {
    %c0 = arith.constant 0 : index
    %c0_0 = arith.constant 0 : index
    %c0_1 = arith.constant 0 : index
    %0 = vector.load %arg1[%c0, %c0_0, %c0_1] : memref<1x128x256xf32, #tpu.memory_space<vmem>>, vector<1x128x256xf32>
    %1 = vector.shape_cast %0 : vector<1x128x256xf32> to vector<128x256xf32>
    %c0_2 = arith.constant 0 : index
    %c0_3 = arith.constant 0 : index
    %2 = vector.load %arg2[%c0_2, %c0_3] : memref<128x256xf32, #tpu.memory_space<vmem>>, vector<128x256xf32>
    %3 = arith.mulf %1, %2 : vector<128x256xf32>
    %cst = arith.constant dense<0.000000e+00> : vector<128xf32>
    %4 = vector.multi_reduction <add>, %3, %cst [1] : vector<128x256xf32> to vector<128xf32>
    %5 = vector.shape_cast %4 : vector<128xf32> to vector<128x1xf32>
    %c0_4 = arith.constant 0 : index
    %c0_5 = arith.constant 0 : index
    %6 = vector.load %arg3[%c0_4, %c0_5] : memref<8x128xf32, #tpu.memory_space<vmem>>, vector<8x128xf32>
    %cst_6 = arith.constant dense<0.000000e+00> : vector<8x1xf32>
    %7 = tpu.matmul %6, %5, %cst_6 {dimension_numbers = #tpu.dot_dimension_numbers<[1], [0], [0], [1], [0, 0, 1, 1], [], []>} : vector<8x128xf32>, vector<128x1xf32>, vector<8x1xf32> -> vector<8x1xf32>
    %cst_7 = arith.constant 0.000000e+00 : f32
    %8 = vector.broadcast %cst_7 : f32 to vector<8x1xf32>
    %9 = arith.maximumf %7, %8 : vector<8x1xf32>
    %c0_8 = arith.constant 0 : index
    %c0_9 = arith.constant 0 : index
    %10 = vector.load %arg4[%c0_8, %c0_9] : memref<128x8xf32, #tpu.memory_space<vmem>>, vector<128x8xf32>
    %cst_10 = arith.constant dense<0.000000e+00> : vector<128x1xf32>
    %11 = tpu.matmul %10, %9, %cst_10 {dimension_numbers = #tpu.dot_dimension_numbers<[1], [0], [0], [1], [0, 0, 1, 1], [], []>} : vector<128x8xf32>, vector<8x1xf32>, vector<128x1xf32> -> vector<128x1xf32>
    %cst_11 = arith.constant 0.000000e+00 : f32
    %12 = vector.broadcast %cst_11 : f32 to vector<128x1xf32>
    %13 = arith.subf %12, %11 : vector<128x1xf32>
    %14 = math.exp %13 : vector<128x1xf32>
    %cst_12 = arith.constant 1.000000e+00 : f32
    %15 = vector.broadcast %cst_12 : f32 to vector<128x1xf32>
    %16 = arith.addf %15, %14 : vector<128x1xf32>
    %cst_13 = arith.constant 1.000000e+00 : f32
    %17 = vector.broadcast %cst_13 : f32 to vector<128x1xf32>
    %18 = arith.divf %17, %16 : vector<128x1xf32>
    %19 = vector.broadcast %18 : vector<128x1xf32> to vector<128x256xf32>
    %20 = arith.mulf %1, %19 : vector<128x256xf32>
    %c0_14 = arith.constant 0 : index
    %c0_15 = arith.constant 0 : index
    %c0_16 = arith.constant 0 : index
    %21 = vector.load %arg5[%c0_14, %c0_15, %c0_16] : memref<1x128x256xf32, #tpu.memory_space<vmem>>, vector<1x128x256xf32>
    %22 = vector.shape_cast %21 : vector<1x128x256xf32> to vector<128x256xf32>
    %23 = vector.shape_cast %20 : vector<128x256xf32> to vector<1x128x256xf32>
    tpu.vector_store %arg5[%c0_14, %c0_15, %c0_16], %23 {strides = array<i32>} : memref<1x128x256xf32, #tpu.memory_space<vmem>>, vector<1x128x256xf32>,
    return
  }
  func.func @transform_0(%arg0: i32) -> (i32, i32, i32) {
    %c0_i32 = arith.constant 0 : i32
    %c0_i32_0 = arith.constant 0 : i32
    %c0_i32_1 = arith.constant 0 : i32
    return %arg0, %c0_i32, %c0_i32_0 : i32, i32, i32
  }
  func.func @transform_1(%arg0: i32) -> (i32, i32) {
    %c0_i32 = arith.constant 0 : i32
    %c0_i32_0 = arith.constant 0 : i32
    %c0_i32_1 = arith.constant 0 : i32
    return %c0_i32, %c0_i32_0 : i32, i32
  }
  func.func @transform_2(%arg0: i32) -> (i32, i32) {
    %c0_i32 = arith.constant 0 : i32
    %c0_i32_0 = arith.constant 0 : i32
    %c0_i32_1 = arith.constant 0 : i32
    return %c0_i32, %c0_i32_0 : i32, i32
  }
  func.func @transform_3(%arg0: i32) -> (i32, i32) {
    %c0_i32 = arith.constant 0 : i32
    %c0_i32_0 = arith.constant 0 : i32
    %c0_i32_1 = arith.constant 0 : i32
    return %c0_i32, %c0_i32_0 : i32, i32
  }
  func.func @transform_4(%arg0: i32) -> (i32, i32, i32) {
    %c0_i32 = arith.constant 0 : i32
    %c0_i32_0 = arith.constant 0 : i32
    %c0_i32_1 = arith.constant 0 : i32
    return %arg0, %c0_i32, %c0_i32_0 : i32, i32, i32
  }
}

</mosaic_0001>

<bundles_post_ra>
// kernel: tpu_custom_call.1
= control target key start
LH: loop header
LB: loop body
LE: loop exit
PB: predicated region body
PF: predicated region fallthrough
CT: control target
= control target key end

     0   :  { %9 = vsyncpa [#allocation3], 0  ;;  %s1919_s0 = inlined_call_operand.hbm [shape: f32[2,128,256], index: 0, kind: input, shape index: {}]   ;;  %s1920_s1 = inlined_call_operand.hbm [shape: f32[128,256], index: 1, kind: input, shape index: {}]   ;;  %s1921_s2 = inlined_call_operand.vmem [shape: f32[8,128], index: 2, kind: input, shape index: {}]   ;;  %s1922_s3 = inlined_call_operand.vmem [shape: f32[128,8], index: 3, kind: input, shape index: {}]   ;;  %s1923_s4 = inlined_call_operand.hbm [shape: f32[2,128,256], index: 4, kind: output, shape index: {}]  }
   0x1   :  { %11 = vsyncpa [#allocation3 + $0x1], 0 }
   0x2   :  { %12 = vsyncpa [#allocation6], 0 }
   0x3   :  { %13 = vsyncpa [#allocation4], 0 }
   0x4   :  { %15 = vsyncpa [#allocation4 + $0x1], 0  ;;  %s1444_s15 = smov 0   ;;  %s1446_s16 = smov 0  }
   0x5   :  { %s1448_s17 = smov 0   ;;  %s1450_s18 = smov 0  }
   0x6 LB: > { %s1465_s19 = sadd.s32 4294967295, %s1406_s18   ;;  %s994_s20 = sadd.s32 4294967294, %s1406_s18   ;;  %s1406_s18 = sphi %s1450_s18, %s1943_s18   ;;  %s1402_s17 = sphi %s1448_s17, %s1942_s17   ;;  %s1398_s16 = sphi %s1446_s16, %s1941_s16   ;;  %s1394_s15 = sphi %s1444_s15, %s1940_s15  }
   0x7   : > { %p41_p0 = scmp.ne.s32.totalorder %s1398_s16, %s1394_s15  ;;  %p1924_p1 = scmp.eq.s32.totalorder %s1465_s19, 0 }
   0x8   : > { %p134_p3 = scmp.eq.s32.totalorder %s994_s20, 1  ;;  %p995_p5 = scmp.ge.s32.totalorder %s1406_s18, 1 }
   0x9   : > { %p1474_p4 = por %p1924_p1, %p41_p0  ;;  %p141_p7 = scmp.lt.s32.totalorder %s1406_s18, 3 }
   0xa   : > { %p1479_p6 = por %p134_p3, %p41_p0  ;;  %s1408_s24 = smov [#allocation5]  }
   0xb   : > { %s1927_s21 = scalar_select %p1474_p4, 1, 0 }
   0xc   : > { %s1928_s22 = scalar_select %p1479_p6, 1, 0 }
   0xd   : > { %p1484_p8 = pnand %p995_p5, %p141_p7  ;;  %s153_s25 = sshll.u32 %s1408_s24, 4  ;;  %s1488_s25 = int_to_ptr.vmem [resolvable:$true] %s153_s25 }
   0xe   : > { %s1500_s27 = sadd.s32 1, %s1406_s18   ;;  %s28_s28 = sadd.s32 1, %s1402_s17 }
   0xf   : > { %s1929_s23 = scalar_select %p1484_p8, 1, 0 }
  0x10   : > { %p1155_p9 = pneg %p1484_p8  ;;  %s25_s29 = ssub.s32 %s1406_s18, %s1500_s27 }
  0x11   : > { %s1278_s6 = scalar_lea.hbm %s1920_s1, 4096 }
  0x12   : > { %p1495_p11 = pnand %p1155_p9, %p1924_p1  ;;  %p1279_p12 = scmp.ne.s32.totalorder %s1920_s1, %s1278_s6 }
  0x13   : > { %p1285_p5 = scmp.lt.u32.totalorder %s1278_s6, %s1920_s1 }
  0x14   : > { %p1280_p13 = pneg %p1495_p11 }
  0x16   : > { %p1281_p0 = pnand %p1280_p13, %p1279_p12 }
  0x18   : > { %p1282_p3 = pneg %p1281_p0 }
  0x1a   : > { %p1287_p7 = pnand %p1285_p5, %p1282_p3 }
  0x1c   : > { %1290 = shalt.err (!%p1287_p7)
}
  0x1d   : > { %s1291_s11 = scalar_lea.vmem %s1488_s25, 4096  ;;  %p1299_p2 = scmp.lt.s32.totalorder %s1488_s25, %s1488_s25 }
  0x1e   : > { %p1292_p9 = scmp.ne.s32.totalorder %s1488_s25, %s1291_s11  ;;  %p1300_p6 = scmp.lt.s32.totalorder %s1291_s11, %s1291_s11 }
  0x20   : > { %p1294_p10 = pnand %p1292_p9, %p1280_p13  ;;  %p1301_p4 = por %p1300_p6, %p1299_p2 }
  0x22   : > { %p1295_p1 = pneg %p1294_p10 }
  0x24   : > { %p1302_p8 = pnand %p1301_p4, %p1295_p1 }
  0x26   : > { %1305 = shalt.err (!%p1302_p8)
}
  0x27   : > { %s1409_s12 = smov 256   ;;  %s1410_s13 = smov 16  }
  0x28   : > { %1158 = dma.hbm_to_vmem [thread:$0]  (!%p1495_p11), %s1920_s1, 4096, %s1488_s25, [#allocation6], %s1409_s12, %s1409_s12, %s1410_s13  }
  0x29   : > { %p26_p1 = scmp.eq.s32.totalorder %s25_s29, 0  ;;  %p35_p2 = scmp.ne.s32.totalorder %s1402_s17, %s1398_s16 }
  0x2a   : > { %p36_p4 = scmp.eq.s32.totalorder %s1406_s18, 0  ;;  %p1168_p6 = scmp.lt.s32.totalorder %s1406_s18, 2 }
  0x2b   : > { %s1534_s24 = scalar_select %p26_p1, %s1402_s17, %s28_s28  }
  0x2c   : > { %p37_p8 = por %p36_p4, %p35_p2  ;;  %p1931_p10 = scmp.eq.s32.totalorder %s1465_s19, 1 }
  0x2d   : > { %s173_s26 = sand.u32 1, %s1402_s17   ;;  %s1026_s5 = sshll.u32 %s1406_s18, 12 }
  0x2e   : > { %p1538_p12 = por %p1931_p10, %p35_p2  ;;  %s998_s6 = sshll.u32 %s173_s26, 8 }
  0x2f   : > { %s1547_s9 = scalar_lea.hbm %s1919_s0, %s1026_s5  ;;  %s177_s25 = scalar_lea.vmem [#allocation2], %s998_s6 }
  0x30   : > { %s184_s28 = sshll.u32 %s177_s25, 4  ;;  %p1549_p11 = pnand %p1168_p6, %p37_p8  ;;  %s1553_s28 = int_to_ptr.vmem [resolvable:$true] %s184_s28 }
  0x31   : > { %s1555_s10 = scalar_lea.sflag [#allocation3], %s173_s26  ;;  %s1306_s11 = scalar_lea.hbm %s1547_s9, 4096 }
  0x32   : > { %p1307_p13 = scmp.ne.s32.totalorder %s1547_s9, %s1306_s11  ;;  %p1308_p0 = pneg %p1549_p11 }
  0x33   : > { %s1311_s5 = scalar_lea.hbm %s1919_s0, 8192  ;;  %p1312_p7 = scmp.lt.u32.totalorder %s1547_s9, %s1919_s0 }
  0x34   : > { %p1309_p3 = pnand %p1308_p0, %p1307_p13  ;;  %p1313_p9 = scmp.lt.u32.totalorder %s1311_s5, %s1306_s11 }
  0x35   : > { %p1315_p2 = scmp.lt.u32.totalorder %s1306_s11, %s1547_s9 }
  0x36   : > { %p1310_p5 = pneg %p1309_p3  ;;  %p1314_p1 = por %p1313_p9, %p1312_p7 }
  0x38   : > { %p1316_p4 = por %p1315_p2, %p1314_p1 }
  0x3a   : > { %p1317_p6 = pnand %p1316_p4, %p1310_p5 }
  0x3c   : > { %1320 = shalt.err (!%p1317_p6)
}
  0x3d   : > { %s1321_s26 = scalar_lea.vmem %s1553_s28, 4096  ;;  %s1411_s8 = smov [#allocation2]  }
  0x3e   : > { %p1322_p8 = scmp.ne.s32.totalorder %s1553_s28, %s1321_s26  ;;  %s1326_s25 = sshll.u32 %s1411_s8, 4  ;;  %s1327_s25 = int_to_ptr.vmem [resolvable:$false] %s1326_s25 }
  0x3f   : > { %s1328_s14 = scalar_lea.vmem %s1327_s25, 8192  ;;  %p1329_p3 = scmp.lt.s32.totalorder %s1553_s28, %s1327_s25 }
  0x40   : > { %p1324_p10 = pnand %p1322_p8, %p1308_p0  ;;  %p1330_p7 = scmp.lt.s32.totalorder %s1328_s14, %s1321_s26 }
  0x42   : > { %p1325_p13 = pneg %p1324_p10  ;;  %p1331_p9 = por %p1330_p7, %p1329_p3 }
  0x44   : > { %p1332_p1 = pnand %p1331_p9, %p1325_p13 }
  0x46   : > { %1335 = shalt.err (!%p1332_p1)
}
  0x47   : > { %1162 = dma.hbm_to_vmem [thread:$0]  (!%p1549_p11), %s1547_s9, 4096, %s1553_s28, %s1555_s10, %s1409_s12, %s1409_s12, %s1410_s13  }
  0x48   : > { %p1934_p0 = scmp.ne.s32.totalorder %s1929_s23, 0 }
  0x49   : > { %s1589_s11 = sand.u32 (!%p1934_p0), 1, %s1398_s16   ;;  %p1935_p5 = scmp.ne.s32.totalorder (!%p1934_p0), %s1927_s21, 0 }
  0x4a   : > { %196 = sbr.rel (%p1934_p0) target bundleno = 913 (0x391), region = 36  ;;  %s1002_s20 = sshll.u32 (!%p1934_p0), %s1589_s11, 8 }
  0x4b   : > { %s199_s5 = scalar_lea.sflag (!%p1934_p0), [#allocation3], %s1589_s11  ;;  %s1595_s29 = scalar_lea.vmem (!%p1934_p0), [#allocation2], %s1002_s20 }
  0x51   : > { %1381 = dma.done.wait (%p1935_p5), %s199_s5, 4096  }
  0x52   : > { %1383 = vsyncadd (%p1935_p5), %s199_s5, 4294963200  ;;  %p1936_p11 = scmp.eq.s32.totalorder %s1465_s19, 0 }
  0x54   : > { %1385 = dma.done.wait (%p1936_p11), [#allocation6], 4096   ;;  %p1937_p2 = pmov %p1936_p11 }
  0x55   : > { %v1606_v0 = vld [vmem:[%s1595_s29 + $0x20] sm:$0xff]  ;;  %v1609_v1 = vld [vmem:[%s1595_s29 + $0x28] sm:$0xff]  ;;  %v1620_v10 = vld [vmem:[%s1595_s29 + $0x30] sm:$0xff]  ;;  %vm1413_vm0 = vmmov 0   ;;  %vm463_vm1 = vcmask 64512   ;;  %s1806_s9 = scalar_lea.vmem [#allocation7], %s1002_s20 }
  0x56   : > { %1387 = vsyncadd (%p1937_p2), [#allocation6], 4294963200  ;;  %v267_v2 = vld [vmem:[#allocation5 + $0x20] sm:$0xff]  ;;  %v268_v3 = vld [vmem:[#allocation5 + $0x28] sm:$0xff]  ;;  %s1027_s20 = sshll.u32 %s1465_s19, 12  ;;  %s911_s28 = sshll.u32 %s1806_s9, 4  ;;  %s1871_s28 = int_to_ptr.vmem [resolvable:$true] %s911_s28 }
  0x57   : > { %v299_v4 = vmul.f32 %v267_v2, %v1606_v0  ;;  %v1613_v5 = vld [vmem:[%s1595_s29] sm:$0xff]  ;;  %v1616_v6 = vld [vmem:[%s1595_s29 + $0x8] sm:$0xff]  ;;  %v300_v7 = vmul.f32 %v268_v3, %v1609_v1  ;;  %v1625_v13 = vld [vmem:[%s1595_s29 + $0x38] sm:$0xff]  ;;  %s1869_s7 = scalar_lea.hbm %s1923_s4, %s1027_s20  ;;  %s898_s19 = scalar_lea.sflag [#allocation4], %s1589_s11 }
  0x58   : > { %v263_v8 = vld [vmem:[#allocation5] sm:$0xff]  ;;  %v264_v9 = vld [vmem:[#allocation5 + $0x8] sm:$0xff]  ;;  %v269_v14 = vld [vmem:[#allocation5 + $0x30] sm:$0xff]  ;;  %s1336_s26 = scalar_lea.vmem %s1871_s28, 4096  ;;  %s1416_s8 = smov [#allocation7]  }
  0x59   : > { %v295_v11 = vmul.f32 %v263_v8, %v1613_v5  ;;  %v296_v12 = vmul.f32 %v264_v9, %v1616_v6  ;;  %v270_v15 = vld [vmem:[#allocation5 + $0x38] sm:$0xff]  ;;  %v333_v16 = vadd.f32 %v300_v7, %v299_v4  ;;  %v301_v17 = vmul.f32 %v269_v14, %v1620_v10  ;;  %v1630_v19 = vld [vmem:[%s1595_s29 + $0x10] sm:$0xff]  ;;  %v1644_v31 = vld [vmem:[%s1595_s29 + $0x40] sm:$0xff]  ;;  %p1337_p4 = scmp.ne.s32.totalorder %s1871_s28, %s1336_s26  ;;  %s1340_s25 = sshll.u32 %s1416_s8, 4  ;;  %s1341_s25 = int_to_ptr.vmem [resolvable:$false] %s1340_s25 }
  0x5a   : > { %v302_v18 = vmul.f32 %v270_v15, %v1625_v13  ;;  %v1633_v20 = vld [vmem:[%s1595_s29 + $0x18] sm:$0xff]  ;;  %v265_v21 = vld [vmem:[#allocation5 + $0x10] sm:$0xff]  ;;  %v1649_v34 = vld [vmem:[%s1595_s29 + $0x48] sm:$0xff]  ;;  %s1342_s14 = scalar_lea.vmem %s1341_s25, 8192  ;;  %p1343_p10 = scmp.lt.s32.totalorder %s1871_s28, %s1341_s25 }
  0x5b   : > { %v327_v22 = vadd.f32 %v296_v12, %v295_v11  ;;  %v266_v23 = vld [vmem:[#allocation5 + $0x18] sm:$0xff]  ;;  %v297_v24 = vmul.f32 %v265_v21, %v1630_v19  ;;  %v1637_v25 = vld [vmem:[%s1595_s29 + $0x50] sm:$0xff]  ;;  %334 = vadd.xlane.f32.xlu1 %v333_v16  ;;  %v271_v35 = vld [vmem:[#allocation5 + $0x40] sm:$0xff]  ;;  %p1338_p6 = pnand %p1337_p4, %p1538_p12  ;;  %p1344_p13 = scmp.lt.s32.totalorder %s1342_s14, %s1336_s26 }
  0x5c   : > { %v1640_v26 = vld [vmem:[%s1595_s29 + $0x58] sm:$0xff]  ;;  %v336_v27 = vadd.f32 %v302_v18, %v301_v17  ;;  %v298_v28 = vmul.f32 %v266_v23, %v1633_v20  ;;  %v273_v29 = vld [vmem:[#allocation5 + $0x50] sm:$0xff]  ;;  %v272_v36 = vld [vmem:[#allocation5 + $0x48] sm:$0xff]  ;;  %v303_v38 = vmul.f32 %v271_v35, %v1644_v31 }
  0x5d   : > { %v274_v30 = vld [vmem:[#allocation5 + $0x58] sm:$0xff]  ;;  %328 = vadd.xlane.f32.xlu0 %v327_v22  ;;  %v305_v32 = vmul.f32 %v273_v29, %v1637_v25  ;;  %v304_v39 = vmul.f32 %v272_v36, %v1649_v34  ;;  %v1654_v40 = vld [vmem:[%s1595_s29 + $0x70] sm:$0xff]  ;;  %v1660_v44 = vld [vmem:[%s1595_s29 + $0x60] sm:$0xff]  ;;  %p1339_p8 = pneg %p1338_p6  ;;  %p1345_p3 = por %p1344_p13, %p1343_p10 }
  0x5e   : > { %v306_v33 = vmul.f32 %v274_v30, %v1640_v26  ;;  %v330_v37 = vadd.f32 %v298_v28, %v297_v24  ;;  %v1657_v41 = vld [vmem:[%s1595_s29 + $0x78] sm:$0xff]  ;;  %v277_v42 = vld [vmem:[#allocation5 + $0x70] sm:$0xff]  ;;  %v1663_v45 = vld [vmem:[%s1595_s29 + $0x68] sm:$0xff] }
  0x5f   : > { %v278_v43 = vld [vmem:[#allocation5 + $0x78] sm:$0xff]  ;;  %337 = vadd.xlane.f32.xlu1 %v336_v27  ;;  %v309_v47 = vmul.f32 %v277_v42, %v1654_v40  ;;  %v275_v49 = vld [vmem:[#allocation5 + $0x60] sm:$0xff]  ;;  %v276_v50 = vld [vmem:[#allocation5 + $0x68] sm:$0xff]  ;;  %v339_v52 = vadd.f32 %v304_v39, %v303_v38  ;;  %p1346_p7 = pnand %p1345_p3, %p1339_p8 }
  0x60   : > { %v342_v46 = vadd.f32 %v306_v33, %v305_v32  ;;  %v310_v48 = vmul.f32 %v278_v43, %v1657_v41  ;;  %v1668_v51 = vld [vmem:[%s1595_s29 + $0x90] sm:$0xff]  ;;  %v307_v53 = vmul.f32 %v275_v49, %v1660_v44  ;;  %v308_v54 = vmul.f32 %v276_v50, %v1663_v45  ;;  %v1673_v55 = vld [vmem:[%s1595_s29 + $0x98] sm:$0xff]  ;;  %v1676_v58 = vld [vmem:[%s1595_s29 + $0x80] sm:$0xff] }
  0x61   : > { %331 = vadd.xlane.f32.xlu0 %v330_v37  ;;  %v281_v56 = vld [vmem:[#allocation5 + $0x90] sm:$0xff]  ;;  %v282_v57 = vld [vmem:[#allocation5 + $0x98] sm:$0xff]  ;;  %v1679_v59 = vld [vmem:[%s1595_s29 + $0x88] sm:$0xff] }
  0x62   : > { %v279_v60 = vld [vmem:[#allocation5 + $0x80] sm:$0xff]  ;;  %v280_v61 = vld [vmem:[#allocation5 + $0x88] sm:$0xff]  ;;  %v348_v62 = vadd.f32 %v310_v48, %v309_v47  ;;  %v313_v63 = vmul.f32 %v281_v56, %v1668_v51  ;;  %v314_v2 = vmul.f32 %v282_v57, %v1673_v55  ;;  %v1684_v3 = vld [vmem:[%s1595_s29 + $0xb0] sm:$0xff]  ;;  %v345_v7 = vadd.f32 %v308_v54, %v307_v53 }
  0x63   : > { %343 = vadd.xlane.f32.xlu1 %v342_v46  ;;  %v1687_v4 = vld [vmem:[%s1595_s29 + $0xb8] sm:$0xff]  ;;  %v311_v8 = vmul.f32 %v279_v60, %v1676_v58  ;;  %v312_v9 = vmul.f32 %v280_v61, %v1679_v59  ;;  %v285_v11 = vld [vmem:[#allocation5 + $0xb0] sm:$0xff]  ;;  %v1692_v14 = vld [vmem:[%s1595_s29 + $0xa0] sm:$0xff] }
  0x64   : > { %v286_v12 = vld [vmem:[#allocation5 + $0xb8] sm:$0xff]  ;;  %v1695_v15 = vld [vmem:[%s1595_s29 + $0xa8] sm:$0xff]  ;;  %v283_v16 = vld [vmem:[#allocation5 + $0xa0] sm:$0xff]  ;;  %v354_v18 = vadd.f32 %v314_v2, %v313_v63  ;;  %v317_v21 = vmul.f32 %v285_v11, %v1684_v3  ;;  %v1412_v63 = vmov 0.0|0.0  }
  0x65   : > { %340 = vadd.xlane.f32.xlu0 %v339_v52  ;;  %v284_v17 = vld [vmem:[#allocation5 + $0xa8] sm:$0xff]  ;;  %v318_v22 = vmul.f32 %v286_v12, %v1687_v4  ;;  %v1700_v23 = vld [vmem:[%s1595_s29 + $0xd0] sm:$0xff]  ;;  %v1703_v24 = vld [vmem:[%s1595_s29 + $0xd8] sm:$0xff]  ;;  %v351_v27 = vadd.f32 %v312_v9, %v311_v8  ;;  %v315_v28 = vmul.f32 %v283_v16, %v1692_v14  ;;  %1123 = vmatprep.subr.bf16.mxu0 %v1412_v63  ;;  %v1414_v12 = vmov 0.0  }
  0x66   : > { %v316_v29 = vmul.f32 %v284_v17, %v1695_v15  ;;  %v289_v30 = vld [vmem:[#allocation5 + $0xd0] sm:$0xff]  ;;  %v290_v32 = vld [vmem:[#allocation5 + $0xd8] sm:$0xff]  ;;  %v1708_v33 = vld [vmem:[%s1595_s29 + $0xc0] sm:$0xff]  ;;  %1094 = vmatprep.mubr.msk.f32.mxu0 %vm1413_vm0, %v1414_v12 }
  0x67   : > { %349 = vadd.xlane.f32.xlu1 %v348_v62  ;;  %v1711_v35 = vld [vmem:[%s1595_s29 + $0xc8] sm:$0xff]  ;;  %v287_v36 = vld [vmem:[#allocation5 + $0xc0] sm:$0xff]  ;;  %v360_v38 = vadd.f32 %v318_v22, %v317_v21  ;;  %v321_v39 = vmul.f32 %v289_v30, %v1700_v23  ;;  %v322_v42 = vmul.f32 %v290_v32, %v1703_v24  ;;  %v1716_v43 = vld [vmem:[%s1595_s29 + $0xf0] sm:$0xff] }
  0x68   : > { %v288_v37 = vld [vmem:[#allocation5 + $0xc8] sm:$0xff]  ;;  %v1719_v46 = vld [vmem:[%s1595_s29 + $0xf8] sm:$0xff]  ;;  %v357_v47 = vadd.f32 %v316_v29, %v315_v28  ;;  %v319_v48 = vmul.f32 %v287_v36, %v1708_v33  ;;  %v293_v50 = vld [vmem:[#allocation5 + $0xf0] sm:$0xff] }
  0x69   : > { %346 = vadd.xlane.f32.xlu0 %v345_v7  ;;  %v320_v49 = vmul.f32 %v288_v37, %v1711_v35  ;;  %v294_v52 = vld [vmem:[#allocation5 + $0xf8] sm:$0xff]  ;;  %v1724_v53 = vld [vmem:[%s1595_s29 + $0xe0] sm:$0xff]  ;;  %v1727_v54 = vld [vmem:[%s1595_s29 + $0xe8] sm:$0xff]  ;;  %v366_v60 = vadd.f32 %v322_v42, %v321_v39  ;;  %v325_v61 = vmul.f32 %v293_v50, %v1716_v43 }
  0x6a   : > { %v291_v56 = vld [vmem:[#allocation5 + $0xe0] sm:$0xff]  ;;  %v292_v57 = vld [vmem:[#allocation5 + $0xe8] sm:$0xff]  ;;  %v326_v62 = vmul.f32 %v294_v52, %v1719_v46  ;;  %v450_v12 = vld [vmem:[%s1922_s3 + $0x18] sm:$0xff] }
  0x6b   : > { %355 = vadd.xlane.f32.xlu1 %v354_v18  ;;  %v363_v2 = vadd.f32 %v320_v49, %v319_v48  ;;  %v323_v7 = vmul.f32 %v291_v56, %v1724_v53  ;;  %v324_v8 = vmul.f32 %v292_v57, %v1727_v54 }
  0x6c   : > { %v372_v9 = vadd.f32 %v326_v62, %v325_v61  ;;  %v375_v62 = vld [vmem:[%s1921_s2] sm:$0xff] }
  0x6d   : > { %352 = vadd.xlane.f32.xlu0 %v351_v27  ;;  %v369_v11 = vadd.f32 %v324_v8, %v323_v7 }
  0x6f   : > { %361 = vadd.xlane.f32.xlu1 %v360_v38 }
  0x71   : > { %358 = vadd.xlane.f32.xlu0 %v357_v47 }
  0x73   : > { %367 = vadd.xlane.f32.xlu1 %v366_v60 }
  0x75   : > { %364 = vadd.xlane.f32.xlu0 %v363_v2  ;;  %v447_v2 = vld [vmem:[%s1922_s3] sm:$0xff] }
  0x76   : > { %1099 = vmatprep.mubr.msk.f32.mxu1 %vm463_vm1, %v447_v2 }
  0x77   : > { %373 = vadd.xlane.f32.xlu1 %v372_v9 }
  0x79   : > { %370 = vadd.xlane.f32.xlu0 %v369_v11  ;;  %v449_v11 = vld [vmem:[%s1922_s3 + $0x10] sm:$0xff] }
  0xe8   : > { %v335_v16 = vpop.xlane.xlu1 %334 }
  0xea   : > { %v329_v17 = vpop.xlane.xlu0 %328 }
  0xec   : > { %v338_v18 = vpop.xlane.xlu1 %337 }
  0xed   : > { %v1127_v29 = vpack.c.bf16 %v338_v18, %v335_v16  ;;  %v451_v16 = vld [vmem:[%s1922_s3 + $0x20] sm:$0xff]  ;;  %v453_v18 = vld [vmem:[%s1922_s3 + $0x30] sm:$0xff] }
  0xee   : > { %v332_v21 = vpop.xlane.xlu0 %331 }
  0xef   : > { %v1124_v22 = vpack.c.bf16 %v332_v21, %v329_v17  ;;  %v452_v17 = vld [vmem:[%s1922_s3 + $0x28] sm:$0xff]  ;;  %v454_v21 = vld [vmem:[%s1922_s3 + $0x38] sm:$0xff] }
  0xf0   : > { %v344_v27 = vpop.xlane.xlu1 %343 }
  0xf1   : > { %1125 = vmatpush3.bf16.msra.mxu0 %v1124_v22  ;;  %v455_v22 = vld [vmem:[%s1922_s3 + $0x40] sm:$0xff] }
  0xf2   : > { %1126 = vmatprep.subr.bf16.mxu0 %v1412_v63  ;;  %v341_v28 = vpop.xlane.xlu0 %340 }
  0xf3   : > { %v1130_v30 = vpack.c.bf16 %v344_v27, %v341_v28  ;;  %v456_v27 = vld [vmem:[%s1922_s3 + $0x48] sm:$0xff]  ;;  %v457_v28 = vld [vmem:[%s1922_s3 + $0x50] sm:$0xff] }
  0xf4   : > { %v350_v32 = vpop.xlane.xlu1 %349 }
  0xf5   : > { %1128 = vmatpush3.bf16.msra.mxu0 %v1127_v29  ;;  %v458_v29 = vld [vmem:[%s1922_s3 + $0x58] sm:$0xff] }
  0xf6   : > { %1129 = vmatprep.subr.bf16.mxu0 %v1412_v63  ;;  %v347_v36 = vpop.xlane.xlu0 %346 }
  0xf7   : > { %v1133_v37 = vpack.c.bf16 %v350_v32, %v347_v36  ;;  %v460_v32 = vld [vmem:[%s1922_s3 + $0x68] sm:$0xff]  ;;  %v461_v36 = vld [vmem:[%s1922_s3 + $0x70] sm:$0xff] }
  0xf8   : > { %v356_v38 = vpop.xlane.xlu1 %355 }
  0xf9   : > { %1131 = vmatpush3.bf16.msra.mxu0 %v1130_v30  ;;  %v459_v30 = vld [vmem:[%s1922_s3 + $0x60] sm:$0xff] }
  0xfa   : > { %1132 = vmatprep.subr.bf16.mxu0 %v1412_v63  ;;  %v353_v39 = vpop.xlane.xlu0 %352 }
  0xfb   : > { %v1136_v42 = vpack.c.bf16 %v356_v38, %v353_v39  ;;  %v1415_v38 = vmov 0  }
  0xfc   : > { %v362_v47 = vpop.xlane.xlu1 %361  ;;  %1212 = vset.pattern.permute.xlu1 %v1415_v38  ;;  %1213 = vset.pattern.permute.xlu0 %v1415_v38 }
  0xfd   : > { %1134 = vmatpush3.bf16.msra.mxu0 %v1133_v37  ;;  %v462_v37 = vld [vmem:[%s1922_s3 + $0x78] sm:$0xff] }
  0xfe   : > { %1135 = vmatprep.subr.bf16.mxu0 %v1412_v63  ;;  %v359_v48 = vpop.xlane.xlu0 %358 }
  0xff   : > { %v1139_v49 = vpack.c.bf16 %v362_v47, %v359_v48 }
 0x100   : > { %v368_v50 = vpop.xlane.xlu1 %367 }
 0x101   : > { %1137 = vmatpush3.bf16.msra.mxu0 %v1136_v42 }
 0x102   : > { %1138 = vmatprep.subr.bf16.mxu0 %v1412_v63  ;;  %v365_v52 = vpop.xlane.xlu0 %364 }
 0x103   : > { %v1142_v56 = vpack.c.bf16 %v368_v50, %v365_v52 }
 0x104   : > { %v374_v57 = vpop.xlane.xlu1 %373 }
 0x105   : > { %1140 = vmatpush3.bf16.msra.mxu0 %v1139_v49 }
 0x106   : > { %1141 = vmatprep.subr.bf16.mxu0 %v1412_v63  ;;  %v371_v60 = vpop.xlane.xlu0 %370 }
 0x107   : > { %v1145_v61 = vpack.c.bf16 %v374_v57, %v371_v60 }
 0x109   : > { %1143 = vmatpush3.bf16.msra.mxu0 %v1142_v56 }
 0x10a   : > { %1144 = vmatprep.subr.bf16.mxu0 %v1412_v63  ;;  %v448_v63 = vld [vmem:[%s1922_s3 + $0x8] sm:$0xff] }
 0x10d   : > { %1146 = vmatpush3.bf16.msra.mxu0 %v1145_v61 }
 0x110   : > { %1095 = vmatmul.mubr.f32.vlgmr.msra.gmra.mrb[0].mxu0 %v375_v62 }
 0x1e3   : > { %v442_v7 = vpop.f32.mrb[0].mxu0 }
 0x1e4   : > { %v446_v8 = vmax.f32 %v442_v7, 0.0  ;;  %v1096_v9 = vpop.f32.mrb[1].mxu0 }
 0x1e6   : > { %1097 = vmatprep.subr.mxu1 %v446_v8 }
 0x1e7   : > { %1098 = vmatpush3.msra.mxu1 %v446_v8 }
 0x1e8   : > { %1100 = vmatmul.mubr.msk.f32.vlgmr.msra.gmra.mrb[0].mxu1 %vm463_vm1, %v448_v63 }
 0x1e9   : > { %1102 = vmatprep.mubr.msk.f32.mxu1 %vm463_vm1, %v449_v11 }
 0x1ec   : > { %1103 = vmatmul.mubr.msk.f32.gmra.mrb[2].mxu1 %vm463_vm1, %v450_v12 }
 0x1ed   : > { %1105 = vmatprep.mubr.msk.f32.mxu1 %vm463_vm1, %v451_v16 }
 0x1f0   : > { %1106 = vmatmul.mubr.msk.f32.gmra.mrb[4].mxu1 %vm463_vm1, %v452_v17 }
 0x1f1   : > { %1108 = vmatprep.mubr.msk.f32.mxu1 %vm463_vm1, %v453_v18 }
 0x1f4   : > { %1109 = vmatmul.mubr.msk.f32.gmra.mrb[6].mxu1 %vm463_vm1, %v454_v21 }
 0x1f5   : > { %1111 = vmatprep.mubr.msk.f32.mxu1 %vm463_vm1, %v455_v22 }
 0x1f8   : > { %1112 = vmatmul.mubr.msk.f32.gmra.mrb[8].mxu1 %vm463_vm1, %v456_v27 }
 0x1f9   : > { %1114 = vmatprep.mubr.msk.f32.mxu1 %vm463_vm1, %v457_v28 }
 0x1fc   : > { %1115 = vmatmul.mubr.msk.f32.gmra.mrb[10].mxu1 %vm463_vm1, %v458_v29 }
 0x1fd   : > { %1117 = vmatprep.mubr.msk.f32.mxu1 %vm463_vm1, %v459_v30 }
 0x200   : > { %1118 = vmatmul.mubr.msk.f32.gmra.mrb[12].mxu1 %vm463_vm1, %v460_v32 }
 0x201   : > { %1120 = vmatprep.mubr.msk.f32.mxu1 %vm463_vm1, %v461_v36 }
 0x204   : > { %1121 = vmatmul.mubr.msk.f32.gmra.mrb[14].mxu1 %vm463_vm1, %v462_v37 }
 0x2bb   : > { %v1101_v39 = vpop.f32.mrb[0].mxu1 }
 0x2bc   : > { %v658_v42 = vsub.f32 0.0, %v1101_v39  ;;  %v578_v47 = vpop.f32.mrb[1].mxu1 }
 0x2bd   : > { %v657_v48 = vsub.f32 0.0, %v578_v47 }
 0x2be   : > { %v675_v49 = vmul.f32 1.442695, %v658_v42 }
 0x2bf   : > { %v673_v50 = vmul.f32 1.442695, %v657_v48  ;;  %v1104_v52 = vpop.f32.mrb[2].mxu1 }
 0x2c0   : > { %1214 = vpow2.f32 %v675_v49  ;;  %v660_v56 = vsub.f32 0.0, %v1104_v52  ;;  %v588_v57 = vpop.f32.mrb[3].mxu1 }
 0x2c1   : > { %1216 = vpow2.f32 %v673_v50  ;;  %v659_v60 = vsub.f32 0.0, %v588_v57 }
 0x2c2   : > { %v679_v61 = vmul.f32 1.442695, %v660_v56 }
 0x2c3   : > { %v677_v62 = vmul.f32 1.442695, %v659_v60  ;;  %v1107_v2 = vpop.f32.mrb[4].mxu1 }
 0x2c4   : > { %1218 = vpow2.f32 %v679_v61  ;;  %v662_v7 = vsub.f32 0.0, %v1107_v2  ;;  %v598_v8 = vpop.f32.mrb[5].mxu1 }
 0x2c5   : > { %1220 = vpow2.f32 %v677_v62  ;;  %v661_v9 = vsub.f32 0.0, %v598_v8 }
 0x2c6   : > { %v683_v63 = vmul.f32 1.442695, %v662_v7 }
 0x2c7   : > { %v681_v11 = vmul.f32 1.442695, %v661_v9  ;;  %v1110_v12 = vpop.f32.mrb[6].mxu1 }
 0x2c8   : > { %1222 = vpow2.f32 %v683_v63  ;;  %v664_v16 = vsub.f32 0.0, %v1110_v12  ;;  %v608_v17 = vpop.f32.mrb[7].mxu1 }
 0x2c9   : > { %1224 = vpow2.f32 %v681_v11  ;;  %v663_v28 = vsub.f32 0.0, %v608_v17 }
 0x2ca   : > { %v1215_v18 = vpop.eup %1214  ;;  %v687_v21 = vmul.f32 1.442695, %v664_v16 }
 0x2cb   : > { %v1217_v22 = vpop.eup %1216  ;;  %v706_v27 = vadd.f32 1.0, %v1215_v18  ;;  %v1113_v29 = vpop.f32.mrb[8].mxu1  ;;  %v685_v48 = vmul.f32 1.442695, %v663_v28 }
 0x2cc   : > { %v705_v30 = vadd.f32 1.0, %v1217_v22  ;;  %1226 = vpow2.f32 %v687_v21  ;;  %v666_v32 = vsub.f32 0.0, %v1113_v29  ;;  %v618_v36 = vpop.f32.mrb[9].mxu1 }
 0x2cd   : > { %1228 = vrcp.f32 %v706_v27  ;;  %v665_v39 = vsub.f32 0.0, %v618_v36 }
 0x2ce   : > { %v1219_v37 = vpop.eup %1218  ;;  %1230 = vrcp.f32 %v705_v30  ;;  %v691_v38 = vmul.f32 1.442695, %v666_v32 }
 0x2cf   : > { %v1221_v42 = vpop.eup %1220  ;;  %v708_v47 = vadd.f32 1.0, %v1219_v37  ;;  %v1116_v49 = vpop.f32.mrb[10].mxu1  ;;  %v689_v61 = vmul.f32 1.442695, %v665_v39 }
 0x2d0   : > { %1232 = vpow2.f32 %v691_v38  ;;  %v668_v50 = vsub.f32 0.0, %v1116_v49  ;;  %v628_v52 = vpop.f32.mrb[11].mxu1  ;;  %v707_v56 = vadd.f32 1.0, %v1221_v42 }
 0x2d1   : > { %1234 = vrcp.f32 %v708_v47  ;;  %v667_v57 = vsub.f32 0.0, %v628_v52 }
 0x2d2   : > { %v1223_v60 = vpop.eup %1222  ;;  %v695_v62 = vmul.f32 1.442695, %v668_v50  ;;  %1236 = vpow2.f32 %v685_v48 }
 0x2d3   : > { %v710_v2 = vadd.f32 1.0, %v1223_v60  ;;  %v1119_v7 = vpop.f32.mrb[12].mxu1  ;;  %v1225_v8 = vpop.eup %1224  ;;  %v693_v11 = vmul.f32 1.442695, %v667_v57 }
 0x2d4   : > { %1238 = vpow2.f32 %v695_v62  ;;  %v670_v9 = vsub.f32 0.0, %v1119_v7  ;;  %v638_v63 = vpop.f32.mrb[13].mxu1  ;;  %v709_v21 = vadd.f32 1.0, %v1225_v8 }
 0x2d5   : > { %1240 = vrcp.f32 %v707_v56  ;;  %v669_v12 = vsub.f32 0.0, %v638_v63 }
 0x2d6   : > { %v1227_v16 = vpop.eup %1226  ;;  %1242 = vpow2.f32 %v689_v61  ;;  %v699_v17 = vmul.f32 1.442695, %v670_v9 }
 0x2d7   : > { %v1229_v18 = vpop.eup %1228  ;;  %1244 = vrcp.f32 %v710_v2  ;;  %v1122_v22 = vpop.f32.mrb[14].mxu1  ;;  %v697_v28 = vmul.f32 1.442695, %v669_v12  ;;  %v712_v39 = vadd.f32 1.0, %v1227_v16 }
 0x2d8   : > { %v1231_v27 = vpop.eup %1230  ;;  %1246 = vpow2.f32 %v699_v17  ;;  %v672_v29 = vsub.f32 0.0, %v1122_v22  ;;  %760 = vperm.xlu1 %1212, %v1229_v18   ;;  %v648_v30 = vpop.f32.mrb[15].mxu1 }
 0x2d9   : > { %1248 = vpow2.f32 %v693_v11  ;;  %755 = vperm.xlu0 %1213, %v1231_v27   ;;  %v671_v37 = vsub.f32 0.0, %v648_v30 }
 0x2da   : > { %v1233_v32 = vpop.eup %1232  ;;  %v703_v36 = vmul.f32 1.442695, %v672_v29  ;;  %1250 = vrcp.f32 %v709_v21 }
 0x2db   : > { %v1235_v38 = vpop.eup %1234  ;;  %v714_v42 = vadd.f32 1.0, %v1233_v32  ;;  %1252 = vpow2.f32 %v697_v28  ;;  %v701_v49 = vmul.f32 1.442695, %v671_v37 }
 0x2dc   : > { %770 = vperm.xlu1 %1212, %v1235_v38   ;;  %v1237_v47 = vpop.eup %1236 }
 0x2dd   : > { %1254 = vrcp.f32 %v714_v42  ;;  %v711_v57 = vadd.f32 1.0, %v1237_v47 }
 0x2de   : > { %v1239_v48 = vpop.eup %1238  ;;  %1256 = vpow2.f32 %v703_v36 }
 0x2df   : > { %v1241_v50 = vpop.eup %1240  ;;  %1258 = vrcp.f32 %v712_v39  ;;  %v716_v52 = vadd.f32 1.0, %v1239_v48 }
 0x2e0   : > { %v1243_v56 = vpop.eup %1242  ;;  %765 = vperm.xlu1 %1212, %v1241_v50  }
 0x2e1   : > { %v1245_v60 = vpop.eup %1244  ;;  %1260 = vrcp.f32 %v716_v52  ;;  %v713_v2 = vadd.f32 1.0, %v1243_v56 }
 0x2e2   : > { %v1247_v61 = vpop.eup %1246  ;;  %1262 = vpow2.f32 %v701_v49 }
 0x2e3   : > { %v1249_v62 = vpop.eup %1248  ;;  %v718_v7 = vadd.f32 1.0, %v1247_v61  ;;  %1264 = vrcp.f32 %v711_v57 }
 0x2e4   : > { %780 = vperm.xlu1 %1212, %v1245_v60   ;;  %v1251_v8 = vpop.eup %1250  ;;  %v715_v63 = vadd.f32 1.0, %v1249_v62 }
 0x2e5   : > { %1266 = vrcp.f32 %v718_v7  ;;  %v1253_v9 = vpop.eup %1252 }
 0x2e6   : > { %1268 = vrcp.f32 %v713_v2  ;;  %v717_v21 = vadd.f32 1.0, %v1253_v9 }
 0x2e7   : > { %v1255_v11 = vpop.eup %1254  ;;  %1270 = vrcp.f32 %v715_v63 }
 0x2e8   : > { %v1257_v12 = vpop.eup %1256  ;;  %775 = vperm.xlu1 %1212, %v1251_v8   ;;  %800 = vperm.xlu0 %1213, %v1255_v11  }
 0x2e9   : > { %v1259_v16 = vpop.eup %1258  ;;  %v720_v17 = vadd.f32 1.0, %v1257_v12 }
 0x2eb   : > { %v1261_v18 = vpop.eup %1260  ;;  %1272 = vrcp.f32 %v720_v17 }
 0x2ec   : > { %v1263_v22 = vpop.eup %1262  ;;  %790 = vperm.xlu1 %1212, %v1259_v16   ;;  %810 = vperm.xlu0 %1213, %v1261_v18   ;;  %1274 = vrcp.f32 %v717_v21 }
 0x2ed   : > { %v1265_v27 = vpop.eup %1264  ;;  %v719_v29 = vadd.f32 1.0, %v1263_v22 }
 0x2ef   : > { %v1267_v28 = vpop.eup %1266  ;;  %1276 = vrcp.f32 %v719_v29 }
 0x2f0   : > { %785 = vperm.xlu1 %1212, %v1265_v27   ;;  %820 = vperm.xlu0 %1213, %v1267_v28   ;;  %v1269_v30 = vpop.eup %1268 }
 0x2f1   : > { %v1271_v32 = vpop.eup %1270 }
 0x2f4   : > { %795 = vperm.xlu1 %1212, %v1269_v30  }
 0x2f5   : > { %v1273_v36 = vpop.eup %1272 }
 0x2f6   : > { %830 = vperm.xlu0 %1213, %v1273_v36   ;;  %v1275_v37 = vpop.eup %1274 }
 0x2f8   : > { %805 = vperm.xlu1 %1212, %v1271_v32  }
 0x2f9   : > { %v1277_v38 = vpop.eup %1276 }
 0x2fc   : > { %815 = vperm.xlu1 %1212, %v1275_v37  }
 0x300   : > { %825 = vperm.xlu1 %1212, %v1277_v38  }
 0x357   : > { %v761_v39 = vpop.permute.xlu1 %760 }
 0x358   : > { %v835_v42 = vmul.f32 %v761_v39, %v1630_v19  ;;  %v836_v47 = vmul.f32 %v761_v39, %v1633_v20  ;;  %v756_v48 = vpop.permute.xlu0 %755 }
 0x359   : > { %v833_v49 = vmul.f32 %v756_v48, %v1613_v5  ;;  %v834_v50 = vmul.f32 %v756_v48, %v1616_v6 }
 0x35a   : > { %867 = vst [vmem:[%s1806_s9 + $0x10] sm:$0xff] %v835_v42  ;;  %868 = vst [vmem:[%s1806_s9 + $0x18] sm:$0xff] %v836_v47 }
 0x35b   : > { %865 = vst [vmem:[%s1806_s9] sm:$0xff] %v833_v49  ;;  %866 = vst [vmem:[%s1806_s9 + $0x8] sm:$0xff] %v834_v50  ;;  %v771_v5 = vpop.permute.xlu1 %770 }
 0x35c   : > { %v839_v6 = vmul.f32 %v771_v5, %v1620_v10  ;;  %v840_v19 = vmul.f32 %v771_v5, %v1625_v13 }
 0x35e   : > { %871 = vst [vmem:[%s1806_s9 + $0x30] sm:$0xff] %v839_v6  ;;  %872 = vst [vmem:[%s1806_s9 + $0x38] sm:$0xff] %v840_v19 }
 0x35f   : > { %v766_v20 = vpop.permute.xlu1 %765 }
 0x360   : > { %v837_v52 = vmul.f32 %v766_v20, %v1606_v0  ;;  %v838_v56 = vmul.f32 %v766_v20, %v1609_v1 }
 0x362   : > { %869 = vst [vmem:[%s1806_s9 + $0x20] sm:$0xff] %v837_v52  ;;  %870 = vst [vmem:[%s1806_s9 + $0x28] sm:$0xff] %v838_v56 }
 0x363   : > { %v781_v57 = vpop.permute.xlu1 %780 }
 0x364   : > { %v843_v60 = vmul.f32 %v781_v57, %v1637_v25  ;;  %v844_v10 = vmul.f32 %v781_v57, %v1640_v26 }
 0x366   : > { %875 = vst [vmem:[%s1806_s9 + $0x50] sm:$0xff] %v843_v60  ;;  %876 = vst [vmem:[%s1806_s9 + $0x58] sm:$0xff] %v844_v10 }
 0x367   : > { %v776_v13 = vpop.permute.xlu1 %775  ;;  %v801_v61 = vpop.permute.xlu0 %800 }
 0x368   : > { %v841_v0 = vmul.f32 %v776_v13, %v1644_v31  ;;  %v842_v1 = vmul.f32 %v776_v13, %v1649_v34  ;;  %v851_v62 = vmul.f32 %v801_v61, %v1668_v51  ;;  %v852_v2 = vmul.f32 %v801_v61, %v1673_v55 }
 0x36a   : > { %873 = vst [vmem:[%s1806_s9 + $0x40] sm:$0xff] %v841_v0  ;;  %874 = vst [vmem:[%s1806_s9 + $0x48] sm:$0xff] %v842_v1 }
 0x36b   : > { %883 = vst [vmem:[%s1806_s9 + $0x90] sm:$0xff] %v851_v62  ;;  %884 = vst [vmem:[%s1806_s9 + $0x98] sm:$0xff] %v852_v2  ;;  %v791_v25 = vpop.permute.xlu1 %790  ;;  %v811_v26 = vpop.permute.xlu0 %810 }
 0x36c   : > { %v847_v7 = vmul.f32 %v791_v25, %v1654_v40  ;;  %v848_v31 = vmul.f32 %v791_v25, %v1657_v41  ;;  %v855_v34 = vmul.f32 %v811_v26, %v1684_v3  ;;  %v856_v51 = vmul.f32 %v811_v26, %v1687_v4 }
 0x36e   : > { %879 = vst [vmem:[%s1806_s9 + $0x70] sm:$0xff] %v847_v7  ;;  %880 = vst [vmem:[%s1806_s9 + $0x78] sm:$0xff] %v848_v31 }
 0x36f   : > { %887 = vst [vmem:[%s1806_s9 + $0xb0] sm:$0xff] %v855_v34  ;;  %888 = vst [vmem:[%s1806_s9 + $0xb8] sm:$0xff] %v856_v51  ;;  %v786_v55 = vpop.permute.xlu1 %785  ;;  %v821_v8 = vpop.permute.xlu0 %820 }
 0x370   : > { %v845_v9 = vmul.f32 %v786_v55, %v1660_v44  ;;  %v846_v40 = vmul.f32 %v786_v55, %v1663_v45  ;;  %v859_v41 = vmul.f32 %v821_v8, %v1700_v23  ;;  %v860_v3 = vmul.f32 %v821_v8, %v1703_v24 }
 0x372   : > { %877 = vst [vmem:[%s1806_s9 + $0x60] sm:$0xff] %v845_v9  ;;  %878 = vst [vmem:[%s1806_s9 + $0x68] sm:$0xff] %v846_v40 }
 0x373   : > { %891 = vst [vmem:[%s1806_s9 + $0xd0] sm:$0xff] %v859_v41  ;;  %892 = vst [vmem:[%s1806_s9 + $0xd8] sm:$0xff] %v860_v3  ;;  %v796_v4 = vpop.permute.xlu1 %795 }
 0x374   : > { %v849_v63 = vmul.f32 %v796_v4, %v1676_v58  ;;  %v850_v11 = vmul.f32 %v796_v4, %v1679_v59 }
 0x375   : > { %v831_v44 = vpop.permute.xlu0 %830 }
 0x376   : > { %881 = vst [vmem:[%s1806_s9 + $0x80] sm:$0xff] %v849_v63  ;;  %882 = vst [vmem:[%s1806_s9 + $0x88] sm:$0xff] %v850_v11  ;;  %v863_v45 = vmul.f32 %v831_v44, %v1716_v43  ;;  %v864_v23 = vmul.f32 %v831_v44, %v1719_v46 }
 0x377   : > { %v806_v24 = vpop.permute.xlu1 %805 }
 0x378   : > { %895 = vst [vmem:[%s1806_s9 + $0xf0] sm:$0xff] %v863_v45  ;;  %896 = vst [vmem:[%s1806_s9 + $0xf8] sm:$0xff] %v864_v23  ;;  %v853_v12 = vmul.f32 %v806_v24, %v1692_v14  ;;  %v854_v58 = vmul.f32 %v806_v24, %v1695_v15 }
 0x37a   : > { %885 = vst [vmem:[%s1806_s9 + $0xa0] sm:$0xff] %v853_v12  ;;  %886 = vst [vmem:[%s1806_s9 + $0xa8] sm:$0xff] %v854_v58 }
 0x37b   : > { %v816_v59 = vpop.permute.xlu1 %815 }
 0x37c   : > { %v857_v16 = vmul.f32 %v816_v59, %v1708_v33  ;;  %v858_v43 = vmul.f32 %v816_v59, %v1711_v35 }
 0x37e   : > { %889 = vst [vmem:[%s1806_s9 + $0xc0] sm:$0xff] %v857_v16  ;;  %890 = vst [vmem:[%s1806_s9 + $0xc8] sm:$0xff] %v858_v43 }
 0x37f   : > { %v826_v46 = vpop.permute.xlu1 %825 }
 0x380   : > { %v861_v14 = vmul.f32 %v826_v46, %v1724_v53  ;;  %v862_v15 = vmul.f32 %v826_v46, %v1727_v54 }
 0x382   : > { %893 = vst [vmem:[%s1806_s9 + $0xe0] sm:$0xff] %v861_v14  ;;  %894 = vst [vmem:[%s1806_s9 + $0xe8] sm:$0xff] %v862_v15 }
 0x383   : > { %1349 = shalt.err (!%p1346_p7)
}
 0x384   : > { %s1350_s5 = scalar_lea.hbm %s1869_s7, 4096  ;;  %s1354_s23 = scalar_lea.hbm %s1923_s4, 8192 }
 0x385   : > { %p1351_p9 = scmp.ne.s32.totalorder %s1869_s7, %s1350_s5  ;;  %p1355_p5 = scmp.lt.u32.totalorder %s1869_s7, %s1923_s4 }
 0x386   : > { %p1356_p11 = scmp.lt.u32.totalorder %s1354_s23, %s1350_s5  ;;  %p1358_p4 = scmp.lt.u32.totalorder %s1350_s5, %s1869_s7 }
 0x387   : > { %p1352_p1 = pnand %p1351_p9, %p1538_p12 }
 0x388   : > { %p1357_p2 = por %p1356_p11, %p1355_p5 }
 0x389   : > { %p1353_p0 = pneg %p1352_p1 }
 0x38a   : > { %p1359_p6 = por %p1358_p4, %p1357_p2 }
 0x38c   : > { %p1360_p8 = pnand %p1359_p6, %p1353_p0 }
 0x38e   : > { %1363 = shalt.err (!%p1360_p8)
}
 0x38f   : > { %s1417_s9 = smov 256   ;;  %s1418_s20 = smov 16  }
 0x390   : > { %1153 = dma.vmem_to_hbm [thread:$0]  (%p1538_p12), %s1871_s28, 4096, %s1869_s7, %s898_s19, %s1417_s9, %s1417_s9, %s1418_s20  }
 0x391 PF: > { %s926_s10 = sand.u32 1, %s1394_s15   ;;  %p1938_p10 = scmp.ne.s32.totalorder %s1928_s22, 0 }
 0x392   : > { %p1939_p13 = scmp.ge.s32.totalorder %s1406_s18, 2  ;;  %s927_s6 = scalar_lea.sflag [#allocation4], %s926_s10 }
 0x394   : > { %p1164_p3 = pnand %p1939_p13, %p1938_p10 }
 0x396   : > { %1389 = dma.done.wait (!%p1164_p3), %s927_s6, 4096  }
 0x397   : > { %1391 = vsyncadd (!%p1164_p3), %s927_s6, 4294963200  ;;  %p18_p7 = scmp.ge.s32.totalorder %s1500_s27, 4   ;;  %s1940_s15 = smov %s1398_s16 }
 0x398   : > { %s1941_s16 = smov %s1402_s17  ;;  %s1942_s17 = smov %s1534_s24 }
 0x399   : > { %s1943_s18 = smov %s1500_s27  ;;  %20 = sbr.rel (!%p18_p7) target bundleno = 6 (0x6), region = 85 }
 0x3a0   :  { %932 = vsyncpa [#allocation3], 1 }
 0x3a1   :  { %934 = vsyncpa [#allocation3 + $0x1], 1 }
 0x3a2   :  { %935 = vsyncpa [#allocation6], 1 }
 0x3a3   :  { %936 = vsyncpa [#allocation4], 1 }
 0x3a4   :  { %938 = vsyncpa [#allocation4 + $0x1], 1 }

</bundles_post_ra>
